<compile_context>
chip_gen: v7x
topology: tpu7x:2x2x1
jax: 0.10.0
libtpu: 0.0.40
codegen_flags: <defaults>
</compile_context>

<pallas_src>
import functools

import jax
import jax.numpy as jnp
from jax import lax
from jax.experimental import pallas as pl
from jax.experimental.pallas import tpu as pltpu


# ----------------------------- Pallas kernel -------------------------------

def _attention_kernel(head_channels,
                      x_kv_ref, x_q_ref, w_ref, rel_ref, wu_ref, bu_ref,
                      o_ref):
    """One (batch, query-block, head) grid step."""
    hc = head_channels
    h = pl.program_id(2)

    x_kv = x_kv_ref[...]          # (C_in+1, S)    keys/values see all positions
    x_q = x_q_ref[...]            # (C_in+1, TQ)   queries see this block only
    w = w_ref[...]                # (3*hc, C_in+1) rows [K; Q*scale; V], bias col

    # Per-head 1x1-conv projections; bias folded via the ones row of x.
    kh = jnp.dot(w[0 * hc:1 * hc, :], x_kv, preferred_element_type=jnp.float32)
    qh = jnp.dot(w[1 * hc:2 * hc, :], x_q, preferred_element_type=jnp.float32)
    vh = jnp.dot(w[2 * hc:3 * hc, :], x_kv, preferred_element_type=jnp.float32)

    # att[n, m] = sum_c kh[c, n] * qh[c, m]   ([key, query] layout: softmax
    # reduces along sublanes and the big V @ P matmul stays MXU-native; only
    # the tiny (hc, S) LHS gets transposed).  bf16 operands, f32 accumulation.
    att = lax.dot_general(kh.astype(jnp.bfloat16), qh.astype(jnp.bfloat16),
                          (((0,), (0,)), ((), ())),
                          preferred_element_type=jnp.float32)        # (S, TQ)
    att = att + rel_ref[...].astype(jnp.float32)

    # softmax over the key axis (== torch dim=-2), all f32.
    mx = jnp.max(att, axis=0, keepdims=True)
    e = jnp.exp(att - mx)
    denom = jnp.sum(e, axis=0, keepdims=True)
    p = e * pl.reciprocal(denom, approx=True)            # divide -> EUP slot

    # out_h[c, m] = sum_n vh[c, n] * p[n, m]; p (largest operand) read as bf16.
    oh = jnp.dot(vh.astype(jnp.bfloat16), p.astype(jnp.bfloat16),
                 preferred_element_type=jnp.float32)                  # (hc, TQ)

    # unifyheads: per-head column-block of Wu accumulated into the resident
    # output block (output index map is constant across the head axis).
    @pl.when(h == 0)
    def _():
        o_ref[...] = jnp.broadcast_to(bu_ref[...], o_ref.shape)

    o_ref[...] += jnp.dot(wu_ref[...], oh, preferred_element_type=jnp.float32)

    # TODO(synk): dropout (p_drop=0.0) is the identity and is omitted.
    # TODO(synk): for much larger S, add flash-style key-axis blocking (running
    # max / denom / accumulator in VMEM scratch) and gather the rel bias from
    # the small pos_enc table in-kernel instead of streaming (S, TQ) blocks.


# ------------------------------- wrapper ------------------------------------

def get_indices(h, w):
    """Matches SelfAttention2d.get_indices (torch.meshgrid default 'ij')."""
    y = jnp.arange(h, dtype=jnp.int32)
    x = jnp.arange(w, dtype=jnp.int32)
    y1, x1, y2, x2 = jnp.meshgrid(y, x, y, x, indexing="ij")
    idx = (y1 - y2 + h - 1) * (2 * w - 1) + x1 - x2 + w - 1
    return idx.reshape(-1)


def prepare_params(params, *, heads, head_channels, height, width):
    """One-time (per weight update) parameter prep, hoisted out of the forward
    path: rel-bias gather, weight repacking, scale/bias folding."""
    S = height * width
    hc = head_channels
    C_out = heads * hc
    scale = float(hc) ** (-0.5)

    def with_bias_col(w, b):                    # (O, I), (O,) -> (O, I+1)
        return jnp.concatenate([w, b[:, None]], axis=1)

    wk = with_bias_col(params["wk"], params["bk"])
    wq = scale * with_bias_col(params["wq"], params["bq"])   # fold 1/sqrt(hc)
    wv = with_bias_col(params["wv"], params["bv"])
    cin1 = wk.shape[1]
    # Per-head fused [K; Q*scale; V] weight blocks: (heads, 3*hc, C_in+1).
    w_kqv = jnp.concatenate([wk.reshape(heads, hc, cin1),
                             wq.reshape(heads, hc, cin1),
                             wv.reshape(heads, hc, cin1)], axis=1)

    # unifyheads weight split per head: Wu[:, h*hc:(h+1)*hc] -> (heads, C_out, hc).
    wu = params["wu"].reshape(C_out, heads, hc).transpose(1, 0, 2)
    bu = params["bu"][:, None]                                       # (C_out, 1)

    # Relative positional bias, pre-gathered to (heads, S, S) in [key, query]
    # order; stored bf16 to halve the dominant HBM stream (added in f32 in-kernel).
    rel = jnp.take(params["pos_enc"], params["relative_indices"], axis=1)
    rel = rel.reshape(heads, S, S).astype(jnp.bfloat16)

    return {"w_kqv": w_kqv, "wu": wu, "bu": bu, "rel": rel}


@functools.partial(jax.jit, static_argnames=("heads", "head_channels", "tq"))
def self_attention_2d_pallas(x_nchw, prepped, *, heads, head_channels, tq=128):
    B, C_in, H, W = x_nchw.shape
    S = H * W
    hc = head_channels
    C_out = heads * hc
    TQ = tq if (S % tq == 0) else S
    nq = S // TQ
    C_aug = C_in + 1

    # NCHW -> (B, C_in+1, S): free reshape + ones row for the bias fold.
    x_aug = jnp.concatenate(
        [x_nchw.reshape(B, C_in, S), jnp.ones((B, 1, S), x_nchw.dtype)], axis=1)

    kernel = functools.partial(_attention_kernel, hc)

    # Advisory cost estimate for the XLA scheduler.
    flops = int(B * heads * (4 * hc * S * S + 2 * C_out * hc * S)
                + B * nq * heads * 2 * 3 * hc * C_aug * S)
    transcendentals = int(B * heads * S * S)
    bytes_accessed = int(2 * B * heads * S * S            # bf16 rel, read per batch
                         + 4 * (2 * B * C_aug * S         # x (K/V stream + Q stream)
                                + B * C_out * S           # output
                                + heads * 3 * hc * C_aug
                                + heads * C_out * hc + C_out))

    grid = (B, nq, heads)       # batch / query-block parallel, heads = reduction

    out_seq = pl.pallas_call(
        kernel,
        out_shape=jax.ShapeDtypeStruct((B, C_out, S), jnp.float32),
        grid=grid,
        in_specs=[
            pl.BlockSpec((None, C_aug, S), lambda b, q, h: (b, 0, 0)),       # x (K/V)
            pl.BlockSpec((None, C_aug, TQ), lambda b, q, h: (b, 0, q)),      # x (Q)
            pl.BlockSpec((None, 3 * hc, C_aug), lambda b, q, h: (h, 0, 0)),  # W_kqv_h
            pl.BlockSpec((None, S, TQ), lambda b, q, h: (h, 0, q)),          # rel bias
            pl.BlockSpec((None, C_out, hc), lambda b, q, h: (h, 0, 0)),      # Wu_h
            pl.BlockSpec((C_out, 1), lambda b, q, h: (0, 0)),                # bu
        ],
        out_specs=pl.BlockSpec((None, C_out, TQ), lambda b, q, h: (b, 0, q)),
        compiler_params=pltpu.CompilerParams(
            dimension_semantics=("parallel", "parallel", "arbitrary"),
            vmem_limit_bytes=32 * 1024 * 1024),
        cost_estimate=pl.CostEstimate(flops=flops,
                                      transcendentals=transcendentals,
                                      bytes_accessed=bytes_accessed),
    )(x_aug, x_aug, prepped["w_kqv"], prepped["rel"], prepped["wu"], prepped["bu"])

    # (B, C_out, S) -> NCHW: free reshape.
    return out_seq.reshape(B, C_out, H, W)


# -------------------------- pure-JAX reference -------------------------------

def self_attention_2d_reference(x_nchw, params, *, heads, head_channels):
    B, C_in, H, W = x_nchw.shape
    S = H * W
    C_out = heads * head_channels
    scale = float(head_channels) ** (-0.5)

    def conv1x1(x, w, b):  # w: (O, I), b: (O,)
        return jnp.einsum("bihw,oi->bohw", x, w) + b[None, :, None, None]

    keys = conv1x1(x_nchw, params["wk"], params["bk"]).reshape(B, heads, head_channels, S)
    values = conv1x1(x_nchw, params["wv"], params["bv"]).reshape(B, heads, head_channels, S)
    queries = conv1x1(x_nchw, params["wq"], params["bq"]).reshape(B, heads, head_channels, S)

    att = jnp.einsum("bhcn,bhcm->bhnm", keys, queries)
    rel = jnp.take(params["pos_enc"], params["relative_indices"], axis=1).reshape(heads, S, S)
    att = att * scale + rel[None]
    att = jax.nn.softmax(att, axis=-2)
    out = jnp.einsum("bhcn,bhnm->bhcm", values, att).reshape(B, C_out, H, W)
    out = conv1x1(out, params["wu"], params["bu"])
    return out


# --------------------------------- main --------------------------------------

if __name__ == "__main__":
    # Module hyper-parameters (small, consistent with the forward pass)
    in_channels = 4
    out_channels = 32
    head_channels = 8
    heads = out_channels // head_channels
    B, H, W = 2, 16, 16

    key = jax.random.PRNGKey(0)
    k1, k2, k3, k4, k5, k6, k7, k8, k9 = jax.random.split(key, 9)

    params = {
        # 1x1-conv weights in natural PyTorch orientation: (C_out, C_in)
        "wk": 0.2 * jax.random.normal(k1, (out_channels, in_channels), jnp.float32),
        "bk": 0.05 * jax.random.normal(k2, (out_channels,), jnp.float32),
        "wq": 0.2 * jax.random.normal(k3, (out_channels, in_channels), jnp.float32),
        "bq": 0.05 * jax.random.normal(k4, (out_channels,), jnp.float32),
        "wv": 0.2 * jax.random.normal(k5, (out_channels, in_channels), jnp.float32),
        "bv": 0.05 * jax.random.normal(k6, (out_channels,), jnp.float32),
        "wu": 0.2 * jax.random.normal(k7, (out_channels, out_channels), jnp.float32),
        "bu": 0.05 * jax.random.normal(k8, (out_channels,), jnp.float32),
        # pos_enc ~ randn(heads, (2H-1)*(2W-1)) as in the module __init__
        "pos_enc": jax.random.normal(k9, (heads, (2 * H - 1) * (2 * W - 1)), jnp.float32),
        "relative_indices": get_indices(H, W),
    }

    x = jax.random.normal(jax.random.PRNGKey(42), (B, in_channels, H, W), jnp.float32)

    # Hoisted parameter prep: run once per weight update, not per forward.
    prepped = prepare_params(params, heads=heads, head_channels=head_channels,
                             height=H, width=W)
    prepped = jax.tree_util.tree_map(jax.block_until_ready, prepped)

    out = self_attention_2d_pallas(x, prepped, heads=heads, head_channels=head_channels)
    out = jax.block_until_ready(out)

    ref = self_attention_2d_reference(x, params, heads=heads, head_channels=head_channels)
    ref = jax.block_until_ready(ref)

    assert out.shape == (B, out_channels, H, W), out.shape
    # Tolerance covers: bf16 MXU operands on the two (S, TQ) matmuls, the bf16
    # rel-bias stream, and the EUP approximate reciprocal in the softmax divide
    # (softmax math and all accumulation remain f32).
    assert jnp.allclose(out, ref, rtol=1e-2, atol=1e-2), float(jnp.max(jnp.abs(out - ref)))

    print("KERNEL_OK")
</pallas_src>

<mosaic_0001>
module attributes {stable_mosaic.version = 11 : i64} {
  func.func @_attention_kernel(%arg0: i32, %arg1: i32, %arg2: i32, %arg3: memref<1x5x256xf32, #tpu.memory_space<vmem>>, %arg4: memref<1x5x128xf32, #tpu.memory_space<vmem>>, %arg5: memref<1x24x5xf32, #tpu.memory_space<vmem>>, %arg6: memref<1x256x128xbf16, #tpu.memory_space<vmem>>, %arg7: memref<1x32x8xf32, #tpu.memory_space<vmem>>, %arg8: memref<32x1xf32, #tpu.memory_space<vmem>>, %arg9: memref<1x32x128xf32, #tpu.memory_space<vmem>>) attributes {dimension_semantics = [#tpu.dimension_semantics<parallel>, #tpu.dimension_semantics<parallel>, #tpu.dimension_semantics<arbitrary>], iteration_bounds = array<i64: 2, 2, 4>, scalar_prefetch = 0 : i64, scratch_operands = 0 : i64, tpu.core_type = #tpu.core_type<tc>, window_params = [{transform_indices = @transform_0, window_bounds = array<i64: 1, 5, 256>}, {transform_indices = @transform_1, window_bounds = array<i64: 1, 5, 128>}, {transform_indices = @transform_2, window_bounds = array<i64: 1, 24, 5>}, {transform_indices = @transform_3, window_bounds = array<i64: 1, 256, 128>}, {transform_indices = @transform_4, window_bounds = array<i64: 1, 32, 8>}, {pipeline_mode = #tpu.pipeline_mode<synchronous>, transform_indices = @transform_5, window_bounds = array<i64: 32, 1>}, {transform_indices = @transform_6, window_bounds = array<i64: 1, 32, 128>}]} {
    %c0 = arith.constant 0 : index
    %c0_0 = arith.constant 0 : index
    %c0_1 = arith.constant 0 : index
    %0 = vector.load %arg3[%c0, %c0_0, %c0_1] : memref<1x5x256xf32, #tpu.memory_space<vmem>>, vector<1x5x256xf32>
    %1 = vector.shape_cast %0 : vector<1x5x256xf32> to vector<5x256xf32>
    %c0_2 = arith.constant 0 : index
    %c0_3 = arith.constant 0 : index
    %c0_4 = arith.constant 0 : index
    %2 = vector.load %arg4[%c0_2, %c0_3, %c0_4] : memref<1x5x128xf32, #tpu.memory_space<vmem>>, vector<1x5x128xf32>
    %3 = vector.shape_cast %2 : vector<1x5x128xf32> to vector<5x128xf32>
    %c0_5 = arith.constant 0 : index
    %c0_6 = arith.constant 0 : index
    %c0_7 = arith.constant 0 : index
    %4 = vector.load %arg5[%c0_5, %c0_6, %c0_7] : memref<1x24x5xf32, #tpu.memory_space<vmem>>, vector<1x24x5xf32>
    %5 = vector.shape_cast %4 : vector<1x24x5xf32> to vector<24x5xf32>
    %6 = vector.extract_strided_slice %5 {offsets = [0, 0], sizes = [8, 5], strides = [1, 1]} : vector<24x5xf32> to vector<8x5xf32>
    %cst = arith.constant dense<0.000000e+00> : vector<8x256xf32>
    %7 = tpu.matmul %6, %1, %cst {dimension_numbers = #tpu.dot_dimension_numbers<[1], [0], [0], [1], [0, 0, 1, 1], [], []>} : vector<8x5xf32>, vector<5x256xf32>, vector<8x256xf32> -> vector<8x256xf32>
    %8 = vector.extract_strided_slice %5 {offsets = [8, 0], sizes = [8, 5], strides = [1, 1]} : vector<24x5xf32> to vector<8x5xf32>
    %cst_8 = arith.constant dense<0.000000e+00> : vector<8x128xf32>
    %9 = tpu.matmul %8, %3, %cst_8 {dimension_numbers = #tpu.dot_dimension_numbers<[1], [0], [0], [1], [0, 0, 1, 1], [], []>} : vector<8x5xf32>, vector<5x128xf32>, vector<8x128xf32> -> vector<8x128xf32>
    %10 = vector.extract_strided_slice %5 {offsets = [16, 0], sizes = [8, 5], strides = [1, 1]} : vector<24x5xf32> to vector<8x5xf32>
    %cst_9 = arith.constant dense<0.000000e+00> : vector<8x256xf32>
    %11 = tpu.matmul %10, %1, %cst_9 {dimension_numbers = #tpu.dot_dimension_numbers<[1], [0], [0], [1], [0, 0, 1, 1], [], []>} : vector<8x5xf32>, vector<5x256xf32>, vector<8x256xf32> -> vector<8x256xf32>
    %12 = arith.truncf %7 : vector<8x256xf32> to vector<8x256xbf16>
    %13 = arith.truncf %9 : vector<8x128xf32> to vector<8x128xbf16>
    %cst_10 = arith.constant dense<0.000000e+00> : vector<256x128xf32>
    %14 = tpu.matmul %12, %13, %cst_10 {dimension_numbers = #tpu.dot_dimension_numbers<[0], [0], [1], [1], [0, 1, 1, 1], [], []>} : vector<8x256xbf16>, vector<8x128xbf16>, vector<256x128xf32> -> vector<256x128xf32>
    %c0_11 = arith.constant 0 : index
    %c0_12 = arith.constant 0 : index
    %c0_13 = arith.constant 0 : index
    %15 = vector.load %arg6[%c0_11, %c0_12, %c0_13] : memref<1x256x128xbf16, #tpu.memory_space<vmem>>, vector<1x256x128xbf16>
    %16 = vector.shape_cast %15 : vector<1x256x128xbf16> to vector<256x128xbf16>
    %17 = arith.extf %16 : vector<256x128xbf16> to vector<256x128xf32>
    %18 = arith.addf %14, %17 : vector<256x128xf32>
    %cst_14 = arith.constant dense<0xFF800000> : vector<128xf32>
    %19 = vector.multi_reduction <maximumf>, %18, %cst_14 [0] : vector<256x128xf32> to vector<128xf32>
    %20 = vector.shape_cast %19 : vector<128xf32> to vector<1x128xf32>
    %21 = vector.broadcast %20 : vector<1x128xf32> to vector<256x128xf32>
    %22 = arith.subf %18, %21 : vector<256x128xf32>
    %23 = math.exp %22 : vector<256x128xf32>
    %cst_15 = arith.constant dense<0.000000e+00> : vector<128xf32>
    %24 = vector.multi_reduction <add>, %23, %cst_15 [0] : vector<256x128xf32> to vector<128xf32>
    %25 = vector.shape_cast %24 : vector<128xf32> to vector<1x128xf32>
    %26 = tpu.reciprocal %25 {approx = true} : vector<1x128xf32> -> vector<1x128xf32>
    %27 = vector.broadcast %26 : vector<1x128xf32> to vector<256x128xf32>
    %28 = arith.mulf %23, %27 : vector<256x128xf32>
    %29 = arith.truncf %11 : vector<8x256xf32> to vector<8x256xbf16>
    %30 = arith.truncf %28 : vector<256x128xf32> to vector<256x128xbf16>
    %cst_16 = arith.constant dense<0.000000e+00> : vector<8x128xf32>
    %31 = tpu.matmul %29, %30, %cst_16 {dimension_numbers = #tpu.dot_dimension_numbers<[1], [0], [0], [1], [0, 0, 1, 1], [], []>} : vector<8x256xbf16>, vector<256x128xbf16>, vector<8x128xf32> -> vector<8x128xf32>
    %c0_i32 = arith.constant 0 : i32
    %32 = arith.cmpi eq, %arg2, %c0_i32 : i32
    %33 = arith.extui %32 : i1 to i32
    %c0_i32_17 = arith.constant 0 : i32
    %34 = arith.cmpi ne, %33, %c0_i32_17 : i32
    scf.if %34 {
      %c0_28 = arith.constant 0 : index
      %c0_29 = arith.constant 0 : index
      %44 = vector.load %arg8[%c0_28, %c0_29] : memref<32x1xf32, #tpu.memory_space<vmem>>, vector<32x1xf32>
      %45 = vector.shape_cast %44 : vector<32x1xf32> to vector<32x1xf32>
      %46 = vector.broadcast %45 : vector<32x1xf32> to vector<32x128xf32>
      %c0_30 = arith.constant 0 : index
      %c0_31 = arith.constant 0 : index
      %c0_32 = arith.constant 0 : index
      %47 = vector.load %arg9[%c0_30, %c0_31, %c0_32] : memref<1x32x128xf32, #tpu.memory_space<vmem>>, vector<1x32x128xf32>
      %48 = vector.shape_cast %47 : vector<1x32x128xf32> to vector<32x128xf32>
      %49 = vector.shape_cast %46 : vector<32x128xf32> to vector<1x32x128xf32>
      tpu.vector_store %arg9[%c0_30, %c0_31, %c0_32], %49 {strides = array<i32>} : memref<1x32x128xf32, #tpu.memory_space<vmem>>, vector<1x32x128xf32>,
    } else {
    }
    %c0_18 = arith.constant 0 : index
    %c0_19 = arith.constant 0 : index
    %c0_20 = arith.constant 0 : index
    %35 = vector.load %arg9[%c0_18, %c0_19, %c0_20] : memref<1x32x128xf32, #tpu.memory_space<vmem>>, vector<1x32x128xf32>
    %36 = vector.shape_cast %35 : vector<1x32x128xf32> to vector<32x128xf32>
    %c0_21 = arith.constant 0 : index
    %c0_22 = arith.constant 0 : index
    %c0_23 = arith.constant 0 : index
    %37 = vector.load %arg7[%c0_21, %c0_22, %c0_23] : memref<1x32x8xf32, #tpu.memory_space<vmem>>, vector<1x32x8xf32>
    %38 = vector.shape_cast %37 : vector<1x32x8xf32> to vector<32x8xf32>
    %cst_24 = arith.constant dense<0.000000e+00> : vector<32x128xf32>
    %39 = tpu.matmul %38, %31, %cst_24 {dimension_numbers = #tpu.dot_dimension_numbers<[1], [0], [0], [1], [0, 0, 1, 1], [], []>} : vector<32x8xf32>, vector<8x128xf32>, vector<32x128xf32> -> vector<32x128xf32>
    %40 = arith.addf %36, %39 : vector<32x128xf32>
    %c0_25 = arith.constant 0 : index
    %c0_26 = arith.constant 0 : index
    %c0_27 = arith.constant 0 : index
    %41 = vector.load %arg9[%c0_25, %c0_26, %c0_27] : memref<1x32x128xf32, #tpu.memory_space<vmem>>, vector<1x32x128xf32>
    %42 = vector.shape_cast %41 : vector<1x32x128xf32> to vector<32x128xf32>
    %43 = vector.shape_cast %40 : vector<32x128xf32> to vector<1x32x128xf32>
    tpu.vector_store %arg9[%c0_25, %c0_26, %c0_27], %43 {strides = array<i32>} : memref<1x32x128xf32, #tpu.memory_space<vmem>>, vector<1x32x128xf32>,
    return
  }
  func.func @transform_0(%arg0: i32, %arg1: i32, %arg2: i32) -> (i32, i32, i32) {
    %c0_i32 = arith.constant 0 : i32
    %c0_i32_0 = arith.constant 0 : i32
    %c0_i32_1 = arith.constant 0 : i32
    return %arg0, %c0_i32, %c0_i32_0 : i32, i32, i32
  }
  func.func @transform_1(%arg0: i32, %arg1: i32, %arg2: i32) -> (i32, i32, i32) {
    %c0_i32 = arith.constant 0 : i32
    %c0_i32_0 = arith.constant 0 : i32
    return %arg0, %c0_i32, %arg1 : i32, i32, i32
  }
  func.func @transform_2(%arg0: i32, %arg1: i32, %arg2: i32) -> (i32, i32, i32) {
    %c0_i32 = arith.constant 0 : i32
    %c0_i32_0 = arith.constant 0 : i32
    %c0_i32_1 = arith.constant 0 : i32
    return %arg2, %c0_i32, %c0_i32_0 : i32, i32, i32
  }
  func.func @transform_3(%arg0: i32, %arg1: i32, %arg2: i32) -> (i32, i32, i32) {
    %c0_i32 = arith.constant 0 : i32
    %c0_i32_0 = arith.constant 0 : i32
    return %arg2, %c0_i32, %arg1 : i32, i32, i32
  }
  func.func @transform_4(%arg0: i32, %arg1: i32, %arg2: i32) -> (i32, i32, i32) {
    %c0_i32 = arith.constant 0 : i32
    %c0_i32_0 = arith.constant 0 : i32
    %c0_i32_1 = arith.constant 0 : i32
    return %arg2, %c0_i32, %c0_i32_0 : i32, i32, i32
  }
  func.func @transform_5(%arg0: i32, %arg1: i32, %arg2: i32) -> (i32, i32) {
    %c0_i32 = arith.constant 0 : i32
    %c0_i32_0 = arith.constant 0 : i32
    %c0_i32_1 = arith.constant 0 : i32
    return %c0_i32, %c0_i32_0 : i32, i32
  }
  func.func @transform_6(%arg0: i32, %arg1: i32, %arg2: i32) -> (i32, i32, i32) {
    %c0_i32 = arith.constant 0 : i32
    %c0_i32_0 = arith.constant 0 : i32
    return %arg0, %c0_i32, %arg1 : i32, i32, i32
  }
}

</mosaic_0001>

<bundles_post_ra>
// kernel: self_attention_2d_pallas.1
= control target key start
LH: loop header
LB: loop body
LE: loop exit
PB: predicated region body
PF: predicated region fallthrough
CT: control target
= control target key end

     0   :  { %s2694_s0 = inlined_call_operand.vmem [shape: f32[2,5,256], index: 0, kind: input, shape index: {}, may-alias: {0,1}]   ;;  %s2695_s1 = inlined_call_operand.vmem [shape: f32[2,5,256], index: 1, kind: input, shape index: {}, may-alias: {0,1}]   ;;  %s2696_s2 = inlined_call_operand.vmem [shape: f32[4,24,5], index: 2, kind: input, shape index: {}]   ;;  %s2697_s3 = inlined_call_operand.hbm [shape: bf16[4,256,256], index: 3, kind: input, shape index: {}]   ;;  %s2698_s4 = inlined_call_operand.vmem [shape: f32[4,32,8], index: 4, kind: input, shape index: {}]   ;;  %s2699_s5 = inlined_call_operand.vmem [shape: f32[32,1], index: 5, kind: input, shape index: {}]   ;;  %s2700_s6 = inlined_call_operand.vmem [shape: f32[2,32,256], index: 6, kind: output, shape index: {}]  }
   0x1   :  { %2705 = sst [smem:[#allocation10_spill]] %s2694_s0 }
   0x2   :  { %2706 = sst [smem:[#allocation11_spill]] %s2696_s2 }
   0x3   :  { %2707 = sst [smem:[#allocation12_spill]] %s2697_s3 }
   0x4   :  { %2708 = sst [smem:[#allocation13_spill]] %s2699_s5 }
   0x5   :  { %2709 = sst [smem:[#allocation14_spill]] %s2700_s6 }
   0x6   :  { %11 = vsyncpa [#allocation3], 0 }
   0x7   :  { %13 = vsyncpa [#allocation3 + $0x1], 0  ;;  %s2108_s21 = smov 0   ;;  %s2110_s22 = smov 0  }
   0x8   :  { %s2112_s23 = smov 0   ;;  %s2114_s24 = smov 0  }
   0x9   :  { %s2116_s25 = smov 0   ;;  %s2118_s26 = smov 0  }
   0xa   :  { %s2120_s27 = smov 0   ;;  %s2122_s28 = smov 0  }
   0xb   :  { %s2124_s29 = smov 0   ;;  %s2126_s30 = smov 0  }
   0xc   :  { %s2128_s7 = smov 0   ;;  %s2130_s8 = smov 0  }
   0xd LB: > { %s1531_s9 = sadd.s32 4294967295, %s2064_s8   ;;  %s31_s10 = sadd.s32 1, %s2052_s29  ;;  %s2064_s8 = sphi %s2130_s8, %s19_s8   ;;  %s2060_s7 = sphi %s2128_s7, %s2738_s7   ;;  %s2056_s30 = sphi %s2126_s30, %s2737_s30   ;;  %s2052_s29 = sphi %s2124_s29, %s2736_s29   ;;  %s2048_s28 = sphi %s2122_s28, %s2735_s28   ;;  %s2044_s27 = sphi %s2120_s27, %s2734_s27   ;;  %s2040_s26 = sphi %s2118_s26, %s2733_s26   ;;  %s2036_s25 = sphi %s2116_s25, %s2732_s25   ;;  %s2032_s24 = sphi %s2114_s24, %s2731_s24   ;;  %s2028_s23 = sphi %s2112_s23, %s2730_s23   ;;  %s2024_s22 = sphi %s2110_s22, %s2729_s22   ;;  %s2020_s21 = sphi %s2108_s21, %s2728_s21  }
   0xe   : > { %p32_p0 = scmp.ge.s32.totalorder %s31_s10, 4  ;;  %s34_s11 = sadd.s32 1, %s2056_s30 }
   0xf   : > { %s38_s12 = sadd.s32 1, %s2060_s7  ;;  %s127_s13 = sadd.s32 1, %s2036_s25 }
  0x10   : > { %s2740_s10 = smov (%p32_p0, %s31_s10), 0  ;;  %s2742_s11 = smov (!%p32_p0, %s34_s11), %s2056_s30 }
  0x11   : > { %2710 = sst [smem:[#allocation6_spill]] %s2740_s10  ;;  %s122_s14 = ssub.s32 %s2052_s29, %s2740_s10 }
  0x12   : > { %p134_p1 = scmp.ne.s32.totalorder %s2036_s25, %s2032_s24  ;;  %p36_p2 = scmp.ge.s32.totalorder %s2742_s11, 2 }
  0x13   : > { %p135_p3 = scmp.eq.s32.totalorder %s2064_s8, 0  ;;  %p140_p4 = scmp.ne.s32.totalorder %s2032_s24, %s2028_s23 }
  0x14   : > { %p141_p5 = scmp.eq.s32.totalorder %s1531_s9, 0  ;;  %s2744_s11 = smov (%p36_p2, %s2742_s11), 0 }
  0x15   : > { %2711 = sst [smem:[#allocation7_spill]] %s2744_s11  ;;  %s2746_s12 = smov (!%p36_p2, %s38_s12), %s2060_s7 }
  0x16   : > { %s123_s15 = ssub.s32 %s2056_s30, %s2744_s11  ;;  %p2188_p6 = por %p135_p3, %p134_p1 }
  0x17   : > { %p40_p7 = scmp.ge.s32.totalorder %s2746_s12, 2  ;;  %s124_s17 = sor.u32 %s123_s15, %s122_s14 }
  0x18   : > { %p125_p8 = scmp.eq.s32.totalorder %s124_s17, 0  ;;  %p2192_p9 = por %p141_p5, %p140_p4 }
  0x19   : > { %s2748_s12 = smov (%p40_p7, %s2746_s12), 0  ;;  %s202_s23 = sadd.s32 1, %s2024_s22 }
  0x1a   : > { %2714 = sst [smem:[#allocation8_spill]] %s2748_s12  ;;  %s197_s20 = ssub.s32 %s2060_s7, %s2748_s12 }
  0x1b   : > { %s2199_s19 = scalar_select %p125_p8, %s2036_s25, %s127_s13  }
  0x1c   : > { %s199_s11 = sor.u32 %s197_s20, %s123_s15  ;;  %p212_p10 = scmp.ne.s32.totalorder %s2024_s22, %s2020_s21 }
  0x1d   : > { %2715 = sst [smem:[#allocation9_spill]] %s2199_s19  ;;  %p200_p11 = scmp.eq.s32.totalorder %s199_s11, 0 }
  0x1e   : > { %p213_p12 = scmp.eq.s32.totalorder %s1531_s9, 15  ;;  %p1764_p13 = scmp.lt.s32.totalorder %s2064_s8, 16 }
  0x1f   : > { %s2208_s14 = scalar_select %p200_p11, %s2024_s22, %s202_s23  }
  0x20   : > { %p2210_p0 = por %p213_p12, %p212_p10  ;;  %s269_s10 = sand.u32 1, %s2036_s25  }
  0x21   : > { %s1535_s6 = sshll.u32 %s269_s10, 7  ;;  %s1536_s5 = sshll.u32 %s2052_s29, 6 }
  0x22   : > { %s2716_s17 = scalar_select %p2210_p0, 1, 0 }
  0x23   : > { %s278_s2 = sadd.s32 %s2056_s30, %s1536_s5  ;;  %s273_s13 = scalar_lea.vmem [#allocation2], %s1535_s6 }
  0x24   : > { %s281_s19 = sshll.u32 %s273_s13, 4  ;;  %s1537_s12 = sshll.u32 %s278_s2, 6  ;;  %s2217_s19 = int_to_ptr.vmem [resolvable:$true] %s281_s19 }
  0x25   : > { %s2717_s3 = sld [smem:[#allocation12_spill]]  ;;  %p2226_p1 = pnand %p1764_p13, %p2188_p6 }
  0x26   : > { %s2230_s5 = scalar_lea.sflag [#allocation3], %s269_s10 }
  0x27   : > { %p1938_p3 = pneg %p2226_p1 }
  0x2b   : > { %s2222_s9 = scalar_lea.hbm %s2717_s3, %s1537_s12  ;;  %s1941_s16 = scalar_lea.hbm %s2717_s3, 16384 }
  0x2c   : > { %s1936_s2 = scalar_lea.hbm %s2222_s9, 2048  ;;  %p1942_p6 = scmp.lt.u32.totalorder %s2222_s9, %s2717_s3 }
  0x2d   : > { %p1937_p2 = scmp.ne.s32.totalorder %s2222_s9, %s1936_s2  ;;  %p1943_p7 = scmp.lt.u32.totalorder %s1941_s16, %s1936_s2 }
  0x2e   : > { %p1945_p10 = scmp.lt.u32.totalorder %s1936_s2, %s2222_s9 }
  0x2f   : > { %p1939_p4 = pnand %p1938_p3, %p1937_p2  ;;  %p1944_p8 = por %p1943_p7, %p1942_p6 }
  0x31   : > { %p1940_p5 = pneg %p1939_p4  ;;  %p1946_p11 = por %p1945_p10, %p1944_p8 }
  0x33   : > { %p1947_p12 = pnand %p1946_p11, %p1940_p5 }
  0x35   : > { %1950 = shalt.err (!%p1947_p12)
}
  0x36   : > { %s1951_s10 = scalar_lea.vmem %s2217_s19, 2048  ;;  %s2066_s15 = smov [#allocation2]  }
  0x37   : > { %p1952_p13 = scmp.ne.s32.totalorder %s2217_s19, %s1951_s10  ;;  %s1956_s20 = sshll.u32 %s2066_s15, 4  ;;  %s1957_s20 = int_to_ptr.vmem [resolvable:$false] %s1956_s20 }
  0x38   : > { %s1958_s6 = scalar_lea.vmem %s1957_s20, 4096  ;;  %p1959_p0 = scmp.lt.s32.totalorder %s2217_s19, %s1957_s20 }
  0x39   : > { %p1954_p2 = pnand %p1952_p13, %p1938_p3  ;;  %p1960_p6 = scmp.lt.s32.totalorder %s1958_s6, %s1951_s10 }
  0x3b   : > { %p1955_p4 = pneg %p1954_p2  ;;  %p1961_p7 = por %p1960_p6, %p1959_p0 }
  0x3d   : > { %p1962_p8 = pnand %p1961_p7, %p1955_p4 }
  0x3f   : > { %1965 = shalt.err (!%p1962_p8)
}
  0x40   : > { %s2067_s2 = smov 128   ;;  %s2068_s12 = smov 64  }
  0x41   : > { %s2069_s16 = smov 4   ;;  %p1538_p3 = scmp.ge.s32.totalorder %s2064_s8, 1 }
  0x42   : > { %1763 = dma.hbm_to_vmem [thread:$0]  (!%p2226_p1), %s2222_s9, 2048, %s2217_s19, %s2230_s5, %s2067_s2, %s2068_s12, %s2069_s16  }
  0x43   : > { %p297_p5 = scmp.lt.s32.totalorder %s2064_s8, 17 }
  0x45   : > { %p298_p10 = pnand %p1538_p3, %p297_p5 }
  0x46   : > { %s303_s23 = sand.u32 (!%p298_p10), 1, %s2032_s24  }
  0x47   : > { %301 = sbr.rel (%p298_p10) target bundleno = 1298 (0x512), region = 44  ;;  %s1539_s13 = sshll.u32 (!%p298_p10), %s303_s23, 7 }
  0x48   : > { %s304_s10 = scalar_lea.sflag (!%p298_p10), [#allocation3], %s303_s23  ;;  %s2261_s15 = scalar_lea.vmem (!%p298_p10), [#allocation2], %s1539_s13 }
  0x4e   : > { %2015 = dma.done.wait (%p2192_p9), %s304_s10, 2048  }
  0x4f   : > { %2017 = vsyncadd (%p2192_p9), %s304_s10, 4294965248  ;;  %s355_s19 = sand.u32 1, %s2020_s21   ;;  %p358_p0 = scmp.lt.s32.totalorder %s2048_s28, 1  ;;  %v2070_v0 = vmov 0.0   ;;  %vm392_vm0 = vcmask 1044480   ;;  %vm388_vm1 = vcmask 39936  }
  0x50   : > { %s2269_s9 = sshll.u32 %s355_s19, 5  ;;  %p365_p1 = scmp.lt.s32.totalorder %s2044_s27, 1  ;;  %463 = vmatprep.mubr.f32.mxu0 %v2070_v0  ;;  %vm2071_vm2 = vmmov 0   ;;  %vm768_vm3 = vcmask 1043456   ;;  %vm719_vm4 = vcmask 64512   ;;  %v1648_v33 = vld [vmem:[%s2261_s15 + $0x8] sm:$0xff]  }
  0x51   : > { %p371_p11 = scmp.lt.s32.totalorder %s2040_s26, 3  ;;  %s2719_s0 = sld [smem:[#allocation10_spill]]  ;;  %v1650_v35 = vld [vmem:[%s2261_s15 + $0x18] sm:$0xff]   ;;  %v1585_v36 = vld [vmem:[%s2261_s15] sm:$0xff]   ;;  %v1649_v38 = vld [vmem:[%s2261_s15 + $0x10] sm:$0xff]   ;;  %v1590_v39 = vunpack.c.l.bf16 %v1648_v33  ;;  %v1591_v43 = vunpack.c.h.bf16 %v1648_v33 }
  0x52   : > { %s359_s11 = scalar_select %p358_p0, %s2048_s28, 1  ;;  %v1598_v40 = vunpack.c.l.bf16 %v1650_v35  ;;  %v1586_v41 = vunpack.c.l.bf16 %v1585_v36  ;;  %v1594_v42 = vunpack.c.l.bf16 %v1649_v38  ;;  %v1599_v44 = vunpack.c.h.bf16 %v1650_v35  ;;  %v1652_v54 = vld [vmem:[%s2261_s15 + $0x28] sm:$0xff]   ;;  %v1651_v59 = vld [vmem:[%s2261_s15 + $0x20] sm:$0xff]  }
  0x53   : > { %s366_s5 = scalar_select %p365_p1, %s2044_s27, 1  ;;  %v1587_v45 = vunpack.c.h.bf16 %v1585_v36  ;;  %v1595_v47 = vunpack.c.h.bf16 %v1649_v38 }
  0x54   : > { %s1582_s20 = sshll.u32 %s359_s11, 4  ;;  %s1543_s18 = sshll.u32 %s359_s11, 1 }
  0x55   : > { %s368_s16 = sadd.s32 %s1543_s18, %s366_s5  ;;  %p1572_p9 = scmp.ne.s32.totalorder %s2040_s26, 0 }
  0x56   : > { %s372_s21 = scalar_select %p371_p11, %s2040_s26, 3 }
  0x57   : > { %s362_s12 = scalar_lea.vmem %s2719_s0, %s1582_s20  ;;  %s1544_s23 = sshll.u32 %s368_s16, 3 }
  0x58   : > { %v383_v1 = vld [vmem:[%s362_s12 + $0x8] sm:$0x1f]  ;;  %v382_v2 = vld [vmem:[%s362_s12] sm:$0x1f]  ;;  %s1757_s13 = smul.u32 24, %s372_s21  ;;  %s1583_s10 = sshll.u32 %s372_s21, 5 }
  0x59   : > { %1548 = vmatprep.subr.msk.mxu0 %vm392_vm0, %v383_v1  ;;  %s2284_s11 = scalar_lea.vmem %s2698_s4, %s1583_s10  ;;  %s370_s5 = scalar_lea.vmem %s2695_s1, %s1544_s23 }
  0x5a   : > { %1549 = vmatpush1.msk.msra.mxu0 %vm392_vm0, %v382_v2  ;;  %s2720_s12 = sld [smem:[#allocation11_spill]]  ;;  %v384_v3 = vld [vmem:[%s370_s5] sm:$0x1f]  ;;  %s2721_s16 = sld [smem:[#allocation13_spill]] (!%p1572_p9) }
  0x5b   : > { %1709 = vmatprep.subr.mxu0 %v2070_v0 }
  0x60   : > { %s375_s0 = scalar_lea.vmem %s2720_s12, %s1757_s13 }
  0x61   : > { %v385_v4 = vld [vmem:[%s375_s0] sm:$0xff]  ;;  %v386_v5 = vld [vmem:[%s375_s0 + $0x8] sm:$0xff]  ;;  %v387_v14 = vld [vmem:[%s375_s0 + $0x10] sm:$0xff]  ;;  %s2612_s0 = scalar_lea.vmem [#allocation4], %s2269_s9 }
  0x62   : > { %1550 = vmatmul.mubr.msk.f32.vlgmr.msra.gmra.mrb[0].mxu0 %vm388_vm1, %v385_v4 }
  0x63   : > { %1710 = vmatpush3.msk.msra.mxu0 %vm392_vm0, %v384_v3  ;;  %1711 = vmatprep.mubr.msk.f32.mxu0 %vm2071_vm2, %v2070_v0  ;;  %v1607_v3 = vunpack.c.h.bf16 %v1652_v54 }
  0x64   : > { %1553 = vmatprep.subr.msk.mxu0 %vm392_vm0, %v383_v1 }
  0x66   : > { %1712 = vmatmul.mubr.msk.f32.vlgmr.msra.gmra.mrb[2].mxu0 %vm388_vm1, %v386_v5  ;;  %v1603_v5 = vunpack.c.h.bf16 %v1651_v59 }
  0x67   : > { %1554 = vmatpush1.msk.msra.mxu0 %vm392_vm0, %v382_v2  ;;  %613 = vmatprep.mubr.f32.mxu0 %v2070_v0  ;;  %v1606_v0 = vunpack.c.l.bf16 %v1652_v54  ;;  %v1602_v2 = vunpack.c.l.bf16 %v1651_v59  ;;  %v1657_v54 = vld [vmem:[%s2261_s15 + $0x50] sm:$0xff]  }
  0x6a   : > { %1555 = vmatmul.mubr.msk.f32.vlgmr.msra.gmra.mrb[4].mxu0 %vm388_vm1, %v387_v14  ;;  %v1653_v14 = vld [vmem:[%s2261_s15 + $0x30] sm:$0xff]  }
 0x135   : > { %v465_v6 = vpop.f32.mrb[0].mxu0 }
 0x136   : > { %v467_v7 = vpop.f32.mrb[1].mxu0  ;;  %v620_v8 = vpack.c.bf16 %v465_v6, %v465_v6 }
 0x137   : > { %v621_v13 = vpack.c.bf16 %v467_v7, %v467_v7 }
 0x138   : > { %687 = vxpose.xlu0.c.b16.start.end [1/1] (short) %v620_v8, 128 }
 0x139   : > { %v542_v9 = vpop.f32.mrb[2].mxu0 }
 0x13a   : > { %v622_v10 = vpack.c.bf16 %v542_v9, %v542_v9  ;;  %v1713_v11 = vpop.f32.mrb[3].mxu0 }
 0x13c   : > { %1756 = vmatprep.subr.msk.bf16.mxu1 %vm768_vm3, %v622_v10  ;;  %v770_v12 = vsel %vm768_vm3, %v622_v10, 0  ;;  %v1654_v10 = vld [vmem:[%s2261_s15 + $0x38] sm:$0xff]  }
 0x13d   : > { %1715 = vmatpush3.bf16.msra.mxu1 %v770_v12 }
 0x155   : > { %703 = vxpose.xlu0.c.b16.start.end [1/1] (short) %v621_v13, 128 }
 0x19e   : > { %v695_v15 = vpop.trf.xlu0 }
 0x19f   : > { %1716 = vmatprep.mubr.msk.bf16.mxu1 %vm719_vm4, %v695_v15 }
 0x1a2   : > { %v696_v16 = vpop.trf.xlu0 }
 0x1a3   : > { %1717 = vmatmul.mubr.msk.bf16.vlgmr.msra.gmra.mrb[0].mxu1 %vm719_vm4, %v696_v16 }
 0x1a6   : > { %v697_v17 = vpop.trf.xlu0 }
 0x1a7   : > { %1720 = vmatprep.mubr.msk.bf16.mxu1 %vm719_vm4, %v697_v17 }
 0x1aa   : > { %v698_v18 = vpop.trf.xlu0 }
 0x1ab   : > { %1721 = vmatmul.mubr.msk.bf16.gmra.mrb[4].mxu1 %vm719_vm4, %v698_v18  ;;  %v1614_v18 = vunpack.c.l.bf16 %v1654_v10 }
 0x1ae   : > { %v699_v19 = vpop.trf.xlu0 }
 0x1af   : > { %1724 = vmatprep.mubr.msk.bf16.mxu1 %vm719_vm4, %v699_v19 }
 0x1b2   : > { %v700_v20 = vpop.trf.xlu0 }
 0x1b3   : > { %1725 = vmatmul.mubr.msk.bf16.gmra.mrb[8].mxu1 %vm719_vm4, %v700_v20  ;;  %v1610_v20 = vunpack.c.l.bf16 %v1653_v14 }
 0x1b6   : > { %v701_v21 = vpop.trf.xlu0 }
 0x1b7   : > { %1728 = vmatprep.mubr.msk.bf16.mxu1 %vm719_vm4, %v701_v21  ;;  %v1615_v21 = vunpack.c.h.bf16 %v1654_v10  ;;  %v1660_v10 = vld [vmem:[%s2261_s15 + $0x68] sm:$0xff]  }
 0x1ba   : > { %v702_v22 = vpop.trf.xlu0 }
 0x1bb   : > { %1729 = vmatmul.mubr.msk.bf16.gmra.mrb[12].mxu1 %vm719_vm4, %v702_v22 }
 0x1be   : > { %v711_v23 = vpop.trf.xlu0 }
 0x1bf   : > { %1732 = vmatprep.mubr.msk.bf16.mxu1 %vm719_vm4, %v711_v23  ;;  %v1611_v23 = vunpack.c.h.bf16 %v1653_v14 }
 0x1c2   : > { %v712_v24 = vpop.trf.xlu0 }
 0x1c3   : > { %1733 = vmatmul.mubr.msk.bf16.gmra.mrb[16].mxu1 %vm719_vm4, %v712_v24 }
 0x1c6   : > { %v713_v25 = vpop.trf.xlu0 }
 0x1c7   : > { %1736 = vmatprep.mubr.msk.bf16.mxu1 %vm719_vm4, %v713_v25 }
 0x1ca   : > { %v714_v26 = vpop.trf.xlu0 }
 0x1cb   : > { %1737 = vmatmul.mubr.msk.bf16.gmra.mrb[20].mxu1 %vm719_vm4, %v714_v26 }
 0x1ce   : > { %v715_v27 = vpop.trf.xlu0 }
 0x1cf   : > { %1740 = vmatprep.mubr.msk.bf16.mxu1 %vm719_vm4, %v715_v27 }
 0x1d2   : > { %v716_v28 = vpop.trf.xlu0 }
 0x1d3   : > { %1741 = vmatmul.mubr.msk.bf16.gmra.mrb[24].mxu1 %vm719_vm4, %v716_v28  ;;  %v1656_v28 = vld [vmem:[%s2261_s15 + $0x48] sm:$0xff]  }
 0x1d4   : > { %v1622_v36 = vunpack.c.l.bf16 %v1656_v28 }
 0x1d6   : > { %v717_v29 = vpop.trf.xlu0 }
 0x1d7   : > { %1744 = vmatprep.mubr.msk.bf16.mxu1 %vm719_vm4, %v717_v29 }
 0x1da   : > { %v718_v30 = vpop.trf.xlu0 }
 0x1db   : > { %1745 = vmatmul.mubr.msk.bf16.gmra.mrb[28].mxu1 %vm719_vm4, %v718_v30 }
 0x276   : > { %v1718_v31 = vpop.f32.mrb[0].mxu1 }
 0x277   : > { %v806_v32 = vpop.f32.mrb[1].mxu1  ;;  %v2318_v48 = vadd.f32 %v1718_v31, %v1590_v39  ;;  %v1623_v39 = vunpack.c.h.bf16 %v1656_v28 }
 0x278   : > { %v1719_v34 = vpop.f32.mrb[2].mxu1  ;;  %v2322_v51 = vadd.f32 %v1586_v41, %v806_v32  ;;  %v1655_v32 = vld [vmem:[%s2261_s15 + $0x40] sm:$0xff]  }
 0x279   : > { %v809_v37 = vpop.f32.mrb[3].mxu1  ;;  %v2327_v55 = vadd.f32 %v1719_v34, %v1591_v43  ;;  %v1618_v38 = vunpack.c.l.bf16 %v1655_v32  ;;  %v1619_v41 = vunpack.c.h.bf16 %v1655_v32 }
 0x27a   : > { %v2334_v60 = vadd.f32 %v1587_v45, %v809_v37 }
 0x27e   : > { %v1722_v46 = vpop.f32.mrb[4].mxu1 }
 0x27f   : > { %v2320_v49 = vadd.f32 %v1722_v46, %v1598_v40  ;;  %v822_v50 = vpop.f32.mrb[5].mxu1  ;;  %v1658_v46 = vld [vmem:[%s2261_s15 + $0x58] sm:$0xff]  }
 0x280   : > { %v2324_v52 = vadd.f32 %v1594_v42, %v822_v50  ;;  %v1723_v53 = vpop.f32.mrb[6].mxu1 }
 0x281   : > { %v935_v56 = vmax.f32 %v2318_v48, %v2320_v49  ;;  %v2331_v57 = vadd.f32 %v1723_v53, %v1599_v44  ;;  %v825_v58 = vpop.f32.mrb[7].mxu1 }
 0x282   : > { %v933_v61 = vmax.f32 %v2322_v51, %v2324_v52  ;;  %v2338_v62 = vadd.f32 %v1595_v47, %v825_v58 }
 0x283   : > { %v936_v63 = vmax.f32 %v2327_v55, %v2331_v57 }
 0x284   : > { %v934_v1 = vmax.f32 %v2334_v60, %v2338_v62 }
 0x286   : > { %v1726_v4 = vpop.f32.mrb[8].mxu1 }
 0x287   : > { %v2344_v6 = vadd.f32 %v1726_v4, %v1606_v0  ;;  %v838_v7 = vpop.f32.mrb[9].mxu1  ;;  %v1626_v0 = vunpack.c.l.bf16 %v1657_v54 }
 0x288   : > { %v2346_v8 = vadd.f32 %v1602_v2, %v838_v7  ;;  %v1727_v9 = vpop.f32.mrb[10].mxu1 }
 0x289   : > { %v939_v11 = vmax.f32 %v935_v56, %v2344_v6  ;;  %v2350_v12 = vadd.f32 %v1727_v9, %v1607_v3  ;;  %v841_v13 = vpop.f32.mrb[11].mxu1  ;;  %v1627_v3 = vunpack.c.h.bf16 %v1657_v54 }
 0x28a   : > { %v937_v15 = vmax.f32 %v933_v61, %v2346_v8  ;;  %v2354_v16 = vadd.f32 %v1603_v5, %v841_v13  ;;  %v1630_v61 = vunpack.c.l.bf16 %v1658_v46 }
 0x28b   : > { %v940_v17 = vmax.f32 %v936_v63, %v2350_v12 }
 0x28c   : > { %v938_v19 = vmax.f32 %v934_v1, %v2354_v16  ;;  %v1631_v1 = vunpack.c.h.bf16 %v1658_v46 }
 0x28e   : > { %v1730_v22 = vpop.f32.mrb[12].mxu1 }
 0x28f   : > { %v2358_v24 = vadd.f32 %v1730_v22, %v1614_v18  ;;  %v854_v25 = vpop.f32.mrb[13].mxu1 }
 0x290   : > { %v2360_v26 = vadd.f32 %v1610_v20, %v854_v25  ;;  %v1731_v27 = vpop.f32.mrb[14].mxu1  ;;  %v1638_v20 = vunpack.c.l.bf16 %v1660_v10 }
 0x291   : > { %v943_v29 = vmax.f32 %v939_v11, %v2358_v24  ;;  %v2364_v30 = vadd.f32 %v1731_v27, %v1615_v21  ;;  %v857_v31 = vpop.f32.mrb[15].mxu1 }
 0x292   : > { %v941_v33 = vmax.f32 %v937_v15, %v2360_v26  ;;  %v2368_v34 = vadd.f32 %v1611_v23, %v857_v31  ;;  %v1659_v15 = vld [vmem:[%s2261_s15 + $0x60] sm:$0xff]   ;;  %v1639_v23 = vunpack.c.h.bf16 %v1660_v10 }
 0x293   : > { %v944_v35 = vmax.f32 %v940_v17, %v2364_v30  ;;  %v1634_v22 = vunpack.c.l.bf16 %v1659_v15  ;;  %v1635_v27 = vunpack.c.h.bf16 %v1659_v15 }
 0x294   : > { %v942_v37 = vmax.f32 %v938_v19, %v2368_v34 }
 0x296   : > { %v1734_v40 = vpop.f32.mrb[16].mxu1 }
 0x297   : > { %v2372_v42 = vadd.f32 %v1734_v40, %v1622_v36  ;;  %v870_v43 = vpop.f32.mrb[17].mxu1 }
 0x298   : > { %v2374_v44 = vadd.f32 %v1618_v38, %v870_v43  ;;  %v1735_v45 = vpop.f32.mrb[18].mxu1  ;;  %v1661_v38 = vld [vmem:[%s2261_s15 + $0x70] sm:$0xff]  }
 0x299   : > { %v947_v47 = vmax.f32 %v943_v29, %v2372_v42  ;;  %v2378_v50 = vadd.f32 %v1735_v45, %v1623_v39  ;;  %v873_v53 = vpop.f32.mrb[19].mxu1  ;;  %v1642_v46 = vunpack.c.l.bf16 %v1661_v38  ;;  %v1643_v54 = vunpack.c.h.bf16 %v1661_v38 }
 0x29a   : > { %v945_v56 = vmax.f32 %v941_v33, %v2374_v44  ;;  %v2382_v58 = vadd.f32 %v1619_v41, %v873_v53  ;;  %v1662_v33 = vld [vmem:[%s2261_s15 + $0x78] sm:$0xff]  }
 0x29b   : > { %v948_v59 = vmax.f32 %v944_v35, %v2378_v50  ;;  %v1646_v43 = vunpack.c.l.bf16 %v1662_v33 }
 0x29c   : > { %v946_v63 = vmax.f32 %v942_v37, %v2382_v58 }
 0x29e   : > { %v1738_v2 = vpop.f32.mrb[20].mxu1 }
 0x29f   : > { %v2386_v4 = vadd.f32 %v1738_v2, %v1630_v61  ;;  %v886_v5 = vpop.f32.mrb[21].mxu1 }
 0x2a0   : > { %v2388_v7 = vadd.f32 %v1626_v0, %v886_v5  ;;  %v1739_v9 = vpop.f32.mrb[22].mxu1 }
 0x2a1   : > { %v951_v11 = vmax.f32 %v947_v47, %v2386_v4  ;;  %v2392_v13 = vadd.f32 %v1739_v9, %v1631_v1  ;;  %v889_v14 = vpop.f32.mrb[23].mxu1  ;;  %v1647_v47 = vunpack.c.h.bf16 %v1662_v33 }
 0x2a2   : > { %v949_v17 = vmax.f32 %v945_v56, %v2388_v7  ;;  %v2396_v18 = vadd.f32 %v1627_v3, %v889_v14 }
 0x2a3   : > { %v952_v19 = vmax.f32 %v948_v59, %v2392_v13 }
 0x2a4   : > { %v950_v21 = vmax.f32 %v946_v63, %v2396_v18 }
 0x2a6   : > { %v1742_v25 = vpop.f32.mrb[24].mxu1 }
 0x2a7   : > { %v2400_v28 = vadd.f32 %v1742_v25, %v1638_v20  ;;  %v902_v29 = vpop.f32.mrb[25].mxu1 }
 0x2a8   : > { %v2402_v31 = vadd.f32 %v1634_v22, %v902_v29  ;;  %v1743_v32 = vpop.f32.mrb[26].mxu1 }
 0x2a9   : > { %v955_v35 = vmax.f32 %v951_v11, %v2400_v28  ;;  %v2406_v36 = vadd.f32 %v1743_v32, %v1639_v23  ;;  %v905_v37 = vpop.f32.mrb[27].mxu1 }
 0x2aa   : > { %v953_v39 = vmax.f32 %v949_v17, %v2402_v31  ;;  %v2410_v40 = vadd.f32 %v1635_v27, %v905_v37 }
 0x2ab   : > { %v956_v41 = vmax.f32 %v952_v19, %v2406_v36 }
 0x2ac   : > { %v954_v45 = vmax.f32 %v950_v21, %v2410_v40 }
 0x2ae   : > { %v1746_v53 = vpop.f32.mrb[28].mxu1 }
 0x2af   : > { %v2414_v56 = vadd.f32 %v1746_v53, %v1646_v43  ;;  %v918_v59 = vpop.f32.mrb[29].mxu1 }
 0x2b0   : > { %v2416_v61 = vadd.f32 %v1642_v46, %v918_v59  ;;  %v1747_v63 = vpop.f32.mrb[30].mxu1 }
 0x2b1   : > { %v959_v0 = vmax.f32 %v955_v35, %v2414_v56  ;;  %v2419_v1 = vadd.f32 %v1747_v63, %v1647_v47  ;;  %v921_v2 = vpop.f32.mrb[31].mxu1 }
 0x2b2   : > { %v957_v3 = vmax.f32 %v953_v39, %v2416_v61  ;;  %v2422_v5 = vadd.f32 %v1643_v54, %v921_v2 }
 0x2b3   : > { %v960_v9 = vmax.f32 %v956_v41, %v2419_v1 }
 0x2b4   : > { %v958_v10 = vmax.f32 %v954_v45, %v2422_v5 }
 0x2b5   : > { %v962_v11 = vmax.f32 %v959_v0, %v960_v9 }
 0x2b6   : > { %v961_v14 = vmax.f32 %v957_v3, %v958_v10 }
 0x2b8   : > { %v963_v15 = vmax.f32 %v961_v14, %v962_v11  ;;  %v2492_v14 = vpop.f32.mrb[4].mxu0 }
 0x2ba   : > { %v964_v17 = vrot.slane %v963_v15, 4 }
 0x2bc   : > { %v965_v19 = vmax.f32 %v963_v15, %v964_v17  ;;  %v617_v17 = vpop.f32.mrb[5].mxu0 }
 0x2be   : > { %v966_v20 = vrot.slane %v965_v19, 2 }
 0x2c0   : > { %v967_v21 = vmax.f32 %v965_v19, %v966_v20  ;;  %v1137_v20 = vpack.c.bf16 %v617_v17, %v617_v17 }
 0x2c2   : > { %v968_v22 = vrot.slane %v967_v21, 1  ;;  %1186 = vmatprep.mubr.bf16.mxu0 %v1137_v20 }
 0x2c4   : > { %v2426_v23 = vmax.f32 %v967_v21, %v968_v22 }
 0x2c6   : > { %v970_v25 = vsub.f32 %v2322_v51, %v2426_v23  ;;  %v971_v27 = vsub.f32 %v2334_v60, %v2426_v23  ;;  %v972_v29 = vsub.f32 %v2318_v48, %v2426_v23  ;;  %v973_v32 = vsub.f32 %v2327_v55, %v2426_v23 }
 0x2c7   : > { %v974_v33 = vsub.f32 %v2324_v52, %v2426_v23  ;;  %v975_v35 = vsub.f32 %v2338_v62, %v2426_v23  ;;  %v976_v37 = vsub.f32 %v2320_v49, %v2426_v23  ;;  %v977_v51 = vsub.f32 %v2331_v57, %v2426_v23 }
 0x2c8   : > { %v978_v60 = vsub.f32 %v2346_v8, %v2426_v23  ;;  %v979_v48 = vsub.f32 %v2354_v16, %v2426_v23  ;;  %v980_v55 = vsub.f32 %v2344_v6, %v2426_v23  ;;  %v981_v52 = vsub.f32 %v2350_v12, %v2426_v23 }
 0x2c9   : > { %v982_v62 = vsub.f32 %v2360_v26, %v2426_v23  ;;  %v983_v49 = vsub.f32 %v2368_v34, %v2426_v23  ;;  %v984_v57 = vsub.f32 %v2358_v24, %v2426_v23  ;;  %v985_v8 = vsub.f32 %v2364_v30, %v2426_v23 }
 0x2ca   : > { %v986_v16 = vsub.f32 %v2374_v44, %v2426_v23  ;;  %v987_v6 = vsub.f32 %v2382_v58, %v2426_v23  ;;  %v988_v12 = vsub.f32 %v2372_v42, %v2426_v23  ;;  %v989_v26 = vsub.f32 %v2378_v50, %v2426_v23 }
 0x2cb   : > { %v990_v34 = vsub.f32 %v2388_v7, %v2426_v23  ;;  %v991_v24 = vsub.f32 %v2396_v18, %v2426_v23  ;;  %v992_v38 = vsub.f32 %v2386_v4, %v2426_v23  ;;  %v993_v39 = vsub.f32 %v2392_v13, %v2426_v23 }
 0x2cc   : > { %v994_v41 = vsub.f32 %v2402_v31, %v2426_v23  ;;  %v995_v43 = vsub.f32 %v2410_v40, %v2426_v23  ;;  %v996_v45 = vsub.f32 %v2400_v28, %v2426_v23  ;;  %v997_v46 = vsub.f32 %v2406_v36, %v2426_v23 }
 0x2cd   : > { %v998_v47 = vsub.f32 %v2416_v61, %v2426_v23  ;;  %v999_v53 = vsub.f32 %v2422_v5, %v2426_v23  ;;  %v1000_v54 = vsub.f32 %v2414_v56, %v2426_v23  ;;  %v1001_v59 = vsub.f32 %v2419_v1, %v2426_v23 }
 0x2ce   : > { %v1002_v63 = vmul.f32 1.442695, %v970_v25  ;;  %v1004_v0 = vmul.f32 1.442695, %v971_v27  ;;  %v1006_v2 = vmul.f32 1.442695, %v972_v29 }
 0x2cf   : > { %v1008_v3 = vmul.f32 1.442695, %v973_v32  ;;  %v1010_v9 = vmul.f32 1.442695, %v974_v33  ;;  %v1012_v10 = vmul.f32 1.442695, %v975_v35 }
 0x2d0   : > { %1868 = vpow2.f32 %v1002_v63  ;;  %v1014_v11 = vmul.f32 1.442695, %v976_v37  ;;  %v1016_v15 = vmul.f32 1.442695, %v977_v51  ;;  %v1018_v22 = vmul.f32 1.442695, %v978_v60 }
 0x2d1   : > { %1870 = vpow2.f32 %v1004_v0  ;;  %v1020_v29 = vmul.f32 1.442695, %v979_v48  ;;  %v1022_v35 = vmul.f32 1.442695, %v980_v55  ;;  %v1024_v60 = vmul.f32 1.442695, %v981_v52 }
 0x2d2   : > { %1872 = vpow2.f32 %v1006_v2  ;;  %v1026_v2 = vmul.f32 1.442695, %v982_v62  ;;  %v1032_v62 = vmul.f32 1.442695, %v985_v8  ;;  %v1052_v4 = vmul.f32 1.442695, %v995_v43 }
 0x2d3   : > { %1874 = vpow2.f32 %v1008_v3  ;;  %v1054_v13 = vmul.f32 1.442695, %v996_v45  ;;  %v1056_v31 = vmul.f32 1.442695, %v997_v46  ;;  %v1058_v40 = vmul.f32 1.442695, %v998_v47 }
 0x2d4   : > { %1876 = vpow2.f32 %v1010_v9  ;;  %v1028_v9 = vmul.f32 1.442695, %v983_v49  ;;  %v1034_v49 = vmul.f32 1.442695, %v986_v16  ;;  %v1060_v28 = vmul.f32 1.442695, %v999_v53 }
 0x2d5   : > { %1878 = vpow2.f32 %v1012_v10  ;;  %v1062_v36 = vmul.f32 1.442695, %v1000_v54  ;;  %v1064_v61 = vmul.f32 1.442695, %v1001_v59 }
 0x2d6   : > { %1880 = vpow2.f32 %v1014_v11  ;;  %v1030_v11 = vmul.f32 1.442695, %v984_v57 }
 0x2d7   : > { %1882 = vpow2.f32 %v1016_v15 }
 0x2d8   : > { %1884 = vpow2.f32 %v1018_v22 }
 0x2d9   : > { %1886 = vpow2.f32 %v1020_v29  ;;  %v1038_v29 = vmul.f32 1.442695, %v988_v12 }
 0x2da   : > { %v2494_v19 = vpop.eup %1868  ;;  %1888 = vpow2.f32 %v1022_v35  ;;  %v1042_v35 = vmul.f32 1.442695, %v990_v34 }
 0x2db   : > { %v2496_v21 = vpop.eup %1870  ;;  %1890 = vpow2.f32 %v1024_v60  ;;  %v1046_v60 = vmul.f32 1.442695, %v992_v38 }
 0x2dc   : > { %v1066_v25 = vadd.f32 %v2496_v21, %v2494_v19  ;;  %v2500_v27 = vpop.eup %1872  ;;  %1892 = vpow2.f32 %v1026_v2 }
 0x2dd   : > { %v2503_v33 = vpop.eup %1874  ;;  %1894 = vpow2.f32 %v1028_v9 }
 0x2de   : > { %v1067_v32 = vadd.f32 %v2500_v27, %v1066_v25  ;;  %v2506_v51 = vpop.eup %1876  ;;  %1896 = vpow2.f32 %v1030_v11  ;;  %v1036_v25 = vmul.f32 1.442695, %v987_v6 }
 0x2df   : > { %v2509_v0 = vpop.eup %1878  ;;  %1898 = vpow2.f32 %v1032_v62 }
 0x2e0   : > { %v1068_v37 = vadd.f32 %v2503_v33, %v1067_v32  ;;  %v2512_v3 = vpop.eup %1880  ;;  %1900 = vpow2.f32 %v1034_v49  ;;  %v1040_v32 = vmul.f32 1.442695, %v989_v26 }
 0x2e1   : > { %v2515_v10 = vpop.eup %1882  ;;  %1902 = vpow2.f32 %v1036_v25 }
 0x2e2   : > { %v1069_v63 = vadd.f32 %v2506_v51, %v1068_v37  ;;  %v2518_v15 = vpop.eup %1884  ;;  %1904 = vpow2.f32 %v1038_v29  ;;  %v1044_v37 = vmul.f32 1.442695, %v991_v24  ;;  %v1050_v24 = vmul.f32 1.442695, %v994_v41 }
 0x2e3   : > { %v2524_v20 = vpop.eup %1886  ;;  %1906 = vpow2.f32 %v1040_v32 }
 0x2e4   : > { %v1070_v48 = vadd.f32 %v2509_v0, %v1069_v63  ;;  %v2530_v22 = vpop.eup %1888  ;;  %1908 = vpow2.f32 %v1042_v35  ;;  %v1048_v63 = vmul.f32 1.442695, %v993_v39 }
 0x2e5   : > { %v2536_v8 = vpop.eup %1890  ;;  %1910 = vpow2.f32 %v1044_v37 }
 0x2e6   : > { %v1071_v55 = vadd.f32 %v2512_v3, %v1070_v48  ;;  %v2542_v16 = vpop.eup %1892  ;;  %1912 = vpow2.f32 %v1046_v60 }
 0x2e7   : > { %v2548_v6 = vpop.eup %1894  ;;  %1914 = vpow2.f32 %v1048_v63 }
 0x2e8   : > { %v1072_v52 = vadd.f32 %v2515_v10, %v1071_v55  ;;  %v2554_v12 = vpop.eup %1896  ;;  %1916 = vpow2.f32 %v1050_v24 }
 0x2e9   : > { %v2560_v26 = vpop.eup %1898  ;;  %1918 = vpow2.f32 %v1052_v4 }
 0x2ea   : > { %v1073_v17 = vadd.f32 %v2518_v15, %v1072_v52  ;;  %v1901_v34 = vpop.eup %1900  ;;  %1920 = vpow2.f32 %v1054_v13 }
 0x2eb   : > { %v1903_v18 = vpop.eup %1902  ;;  %1922 = vpow2.f32 %v1056_v31 }
 0x2ec   : > { %v1074_v57 = vadd.f32 %v2524_v20, %v1073_v17  ;;  %v1905_v9 = vpop.eup %1904  ;;  %1924 = vpow2.f32 %v1058_v40 }
 0x2ed   : > { %v1907_v55 = vpop.eup %1906  ;;  %1926 = vpow2.f32 %v1060_v28 }
 0x2ee   : > { %v1075_v30 = vadd.f32 %v2530_v22, %v1074_v57  ;;  %v1909_v11 = vpop.eup %1908  ;;  %1928 = vpow2.f32 %v1062_v36 }
 0x2ef   : > { %v1911_v52 = vpop.eup %1910  ;;  %1930 = vpow2.f32 %v1064_v61 }
 0x2f0   : > { %v1076_v44 = vadd.f32 %v2536_v8, %v1075_v30  ;;  %v1913_v62 = vpop.eup %1912 }
 0x2f1   : > { %v1915_v17 = vpop.eup %1914 }
 0x2f2   : > { %v1077_v58 = vadd.f32 %v2542_v16, %v1076_v44  ;;  %v1917_v49 = vpop.eup %1916 }
 0x2f3   : > { %v1919_v57 = vpop.eup %1918 }
 0x2f4   : > { %v1078_v42 = vadd.f32 %v2548_v6, %v1077_v58  ;;  %v1921_v5 = vpop.eup %1920 }
 0x2f5   : > { %v1923_v30 = vpop.eup %1922 }
 0x2f6   : > { %v1079_v50 = vadd.f32 %v2554_v12, %v1078_v42  ;;  %v1925_v44 = vpop.eup %1924 }
 0x2f7   : > { %v1927_v56 = vpop.eup %1926 }
 0x2f8   : > { %v1080_v7 = vadd.f32 %v2560_v26, %v1079_v50  ;;  %v1929_v58 = vpop.eup %1928 }
 0x2f9   : > { %v1931_v42 = vpop.eup %1930 }
 0x2fa   : > { %v1081_v2 = vadd.f32 %v1901_v34, %v1080_v7 }
 0x2fc   : > { %v1082_v48 = vadd.f32 %v1903_v18, %v1081_v2 }
 0x2fe   : > { %v1083_v38 = vadd.f32 %v1905_v9, %v1082_v48 }
 0x300   : > { %v1084_v39 = vadd.f32 %v1907_v55, %v1083_v38 }
 0x302   : > { %v1085_v41 = vadd.f32 %v1909_v11, %v1084_v39 }
 0x304   : > { %v1086_v43 = vadd.f32 %v1911_v52, %v1085_v41 }
 0x306   : > { %v1087_v45 = vadd.f32 %v1913_v62, %v1086_v43 }
 0x308   : > { %v1088_v46 = vadd.f32 %v1915_v17, %v1087_v45 }
 0x30a   : > { %v1089_v47 = vadd.f32 %v1917_v49, %v1088_v46 }
 0x30c   : > { %v1090_v25 = vadd.f32 %v1919_v57, %v1089_v47 }
 0x30e   : > { %v1091_v53 = vadd.f32 %v1921_v5, %v1090_v25 }
 0x310   : > { %v1092_v29 = vadd.f32 %v1923_v30, %v1091_v53 }
 0x312   : > { %v1093_v32 = vadd.f32 %v1925_v44, %v1092_v29 }
 0x314   : > { %v1094_v54 = vadd.f32 %v1927_v56, %v1093_v32 }
 0x316   : > { %v1095_v35 = vadd.f32 %v1929_v58, %v1094_v54 }
 0x318   : > { %v1096_v37 = vadd.f32 %v1931_v42, %v1095_v35 }
 0x31a   : > { %v1097_v50 = vrot.slane %v1096_v37, 4 }
 0x31c   : > { %v1098_v1 = vadd.f32 %v1097_v50, %v1096_v37  ;;  %v1201_v50 = vld [vmem:[%s2721_s16 + $0x18] sm:$0xff] (!%p1572_p9) }
 0x31e   : > { %v1099_v23 = vrot.slane %v1098_v1, 2 }
 0x320   : > { %v1100_v59 = vadd.f32 %v1099_v23, %v1098_v1  ;;  %v1199_v1 = vld [vmem:[%s2721_s16 + $0x8] sm:$0xff] (!%p1572_p9) }
 0x322   : > { %v1101_v60 = vrot.slane %v1100_v59, 1 }
 0x324   : > { %v1102_v7 = vadd.f32 %v1101_v60, %v1100_v59 }
 0x326   : > { %1932 = vrcp.f32 %v1102_v7 }
 0x330   : > { %v1933_v63 = vpop.eup %1932 }
 0x331   : > { %v1120_v2 = vmul.f32 %v1933_v63, %v1901_v34  ;;  %v1121_v24 = vmul.f32 %v1933_v63, %v1903_v18  ;;  %v1104_v48 = vmul.f32 %v1933_v63, %v2494_v19  ;;  %v1105_v4 = vmul.f32 %v1933_v63, %v2496_v21 }
 0x332   : > { %v1122_v38 = vmul.f32 %v1933_v63, %v1905_v9  ;;  %v1123_v13 = vmul.f32 %v1933_v63, %v1907_v55  ;;  %v1106_v39 = vmul.f32 %v1933_v63, %v2500_v27  ;;  %v1107_v31 = vmul.f32 %v1933_v63, %v2503_v33 }
 0x333   : > { %v1146_v41 = vpack.c.bf16 %v1121_v24, %v1120_v2  ;;  %v1138_v40 = vpack.c.bf16 %v1105_v4, %v1104_v48  ;;  %v1124_v43 = vmul.f32 %v1933_v63, %v1909_v11  ;;  %v1125_v28 = vmul.f32 %v1933_v63, %v1911_v52 }
 0x334   : > { %v1147_v45 = vpack.c.bf16 %v1123_v13, %v1122_v38  ;;  %v1126_v46 = vmul.f32 %v1933_v63, %v1913_v62  ;;  %v1127_v34 = vmul.f32 %v1933_v63, %v1915_v17  ;;  %v1128_v18 = vmul.f32 %v1933_v63, %v1917_v49 }
 0x335   : > { %1682 = vmatprep.subr.bf16.mxu0 %v1146_v41  ;;  %v1148_v36 = vpack.c.bf16 %v1125_v28, %v1124_v43  ;;  %v1129_v19 = vmul.f32 %v1933_v63, %v1919_v57  ;;  %v1139_v21 = vpack.c.bf16 %v1107_v31, %v1106_v39  ;;  %v1130_v55 = vmul.f32 %v1933_v63, %v1921_v5 }
 0x336   : > { %1683 = vmatpush3.bf16.msra.mxu0 %v1138_v40  ;;  %v1149_v9 = vpack.c.bf16 %v1127_v34, %v1126_v46  ;;  %v1108_v27 = vmul.f32 %v1933_v63, %v2506_v51  ;;  %v1109_v33 = vmul.f32 %v1933_v63, %v2509_v0  ;;  %v1131_v47 = vmul.f32 %v1933_v63, %v1923_v30 }
 0x337   : > { %1684 = vmatprep.subr.bf16.mxu0 %v1147_v45  ;;  %v1150_v61 = vpack.c.bf16 %v1129_v19, %v1128_v18  ;;  %v1132_v11 = vmul.f32 %v1933_v63, %v1925_v44  ;;  %v1133_v52 = vmul.f32 %v1933_v63, %v1927_v56  ;;  %v1134_v53 = vmul.f32 %v1933_v63, %v1929_v58 }
 0x338   : > { %v1151_v25 = vpack.c.bf16 %v1131_v47, %v1130_v55  ;;  %v1135_v17 = vmul.f32 %v1933_v63, %v1931_v42  ;;  %v1140_v49 = vpack.c.bf16 %v1109_v33, %v1108_v27  ;;  %v1110_v57 = vmul.f32 %v1933_v63, %v2512_v3 }
 0x339   : > { %v1152_v62 = vpack.c.bf16 %v1133_v52, %v1132_v11  ;;  %v1111_v29 = vmul.f32 %v1933_v63, %v2515_v10  ;;  %v1112_v0 = vmul.f32 %v1933_v63, %v2518_v15  ;;  %v1113_v30 = vmul.f32 %v1933_v63, %v2524_v20 }
 0x33a   : > { %1685 = vmatpush3.bf16.msra.mxu0 %v1139_v21  ;;  %v1153_v5 = vpack.c.bf16 %v1135_v17, %v1134_v53  ;;  %v1114_v32 = vmul.f32 %v1933_v63, %v2530_v22  ;;  %v1115_v56 = vmul.f32 %v1933_v63, %v2536_v8  ;;  %v1116_v10 = vmul.f32 %v1933_v63, %v2542_v16 }
 0x33b   : > { %1686 = vmatprep.subr.bf16.mxu0 %v1148_v36  ;;  %v1141_v51 = vpack.c.bf16 %v1111_v29, %v1110_v57  ;;  %v1142_v44 = vpack.c.bf16 %v1113_v30, %v1112_v0  ;;  %v1117_v54 = vmul.f32 %v1933_v63, %v2548_v6  ;;  %v1118_v20 = vmul.f32 %v1933_v63, %v2554_v12  ;;  %v1200_v12 = vld [vmem:[%s2721_s16 + $0x10] sm:$0xff] (!%p1572_p9) }
 0x33c   : > { %v1143_v3 = vpack.c.bf16 %v1115_v56, %v1114_v32  ;;  %v1119_v58 = vmul.f32 %v1933_v63, %v2560_v26  ;;  %v1136_v8 = vpack.c.bf16 %v2492_v14, %v2492_v14  ;;  %v1198_v14 = vld [vmem:[%s2721_s16] sm:$0xff] (!%p1572_p9)  ;;  %v2072_v26 = vmov (!%p1572_p9), 0  }
 0x33d   : > { %v1144_v15 = vpack.c.bf16 %v1117_v54, %v1116_v10  ;;  %1935 = vset.pattern.permute.xlu1 (!%p1572_p9), %v2072_v26  ;;  %1934 = vset.pattern.permute.xlu0 (!%p1572_p9), %v2072_v26 }
 0x33e   : > { %1687 = vmatpush3.bf16.msra.mxu0 %v1140_v49  ;;  %v1145_v22 = vpack.c.bf16 %v1119_v58, %v1118_v20  ;;  %1214 = vperm.xlu1 (!%p1572_p9), %1935, %v1200_v12  }
 0x33f   : > { %1688 = vmatprep.subr.bf16.mxu0 %v1149_v9  ;;  %1204 = vperm.xlu0 (!%p1572_p9), %1934, %v1198_v14  }
 0x342   : > { %1689 = vmatpush3.bf16.msra.mxu0 %v1141_v51  ;;  %1219 = vperm.xlu1 (!%p1572_p9), %1935, %v1201_v50  }
 0x343   : > { %1690 = vmatprep.subr.bf16.mxu0 %v1150_v61  ;;  %1209 = vperm.xlu0 (!%p1572_p9), %1934, %v1199_v1  }
 0x346   : > { %1691 = vmatpush3.bf16.msra.mxu0 %v1142_v44 }
 0x347   : > { %1692 = vmatprep.subr.bf16.mxu0 %v1151_v25 }
 0x34a   : > { %1693 = vmatpush3.bf16.msra.mxu0 %v1143_v3 }
 0x34b   : > { %1694 = vmatprep.subr.bf16.mxu0 %v1152_v62 }
 0x34e   : > { %1695 = vmatpush3.bf16.msra.mxu0 %v1144_v15 }
 0x34f   : > { %1696 = vmatprep.subr.bf16.mxu0 %v1153_v5 }
 0x352   : > { %1697 = vmatpush3.bf16.msra.mxu0 %v1145_v22 }
 0x355   : > { %1187 = vmatmul.mubr.bf16.vlgmr.msra.gmra.mrb[8].mxu0 %v1136_v8 }
 0x3bd   : > { %v1215_v23 = vpop.permute.xlu1 (!%p1572_p9), %1214 }
 0x3be   : > { %v1205_v59 = vpop.permute.xlu0 (!%p1572_p9), %1204  ;;  %1224 = vst [vmem:[%s2612_s0 + $0x10] sm:$0xff] (!%p1572_p9), %v1215_v23 }
 0x3bf   : > { %1222 = vst [vmem:[%s2612_s0] sm:$0xff] (!%p1572_p9), %v1205_v59 }
 0x3c1   : > { %v1220_v60 = vpop.permute.xlu1 (!%p1572_p9), %1219 }
 0x3c2   : > { %v1210_v7 = vpop.permute.xlu0 (!%p1572_p9), %1209  ;;  %1225 = vst [vmem:[%s2612_s0 + $0x18] sm:$0xff] (!%p1572_p9), %v1220_v60 }
 0x3c3   : > { %1223 = vst [vmem:[%s2612_s0 + $0x8] sm:$0xff] (!%p1572_p9), %v1210_v7 }
 0x425   : > { %1197 = sbr.rel (%p1572_p9) target bundleno = 1068 (0x42c), region = 52 }
 0x428   : > { %v1698_v35 = vpop.f32.mrb[8].mxu0 }
 0x429   : > { %v1699_v16 = vpop.f32.mrb[9].mxu0 }
 0x42a   : > { %v1700_v42 = vadd.f32 %v1699_v16, %v1698_v35  ;;  %v1701_v6 = vpop.f32.mrb[10].mxu0 }
 0x42b   : > { %v1702_v37 = vpop.f32.mrb[11].mxu0 }
 0x42c PF: > { %1748 = vmatprep.subr.mxu0 %v1700_v42  ;;  %v1230_v63 = vld [vmem:[%s2284_s11] sm:$0xff]  ;;  %v1231_v2 = vld [vmem:[%s2284_s11 + $0x8] sm:$0xff]  ;;  %v1232_v24 = vld [vmem:[%s2284_s11 + $0x10] sm:$0xff]  ;;  %p2722_p12 = scmp.ne.s32.totalorder %s2716_s17, 0 }
 0x42d   : > { %1749 = vmatpush3.msra.mxu0 %v1700_v42  ;;  %1750 = vmatprep.mubr.msk.f32.mxu0 %vm719_vm4, %v1230_v63  ;;  %v1233_v48 = vld [vmem:[%s2284_s11 + $0x18] sm:$0xff]  ;;  %v1227_v4 = vld [vmem:[%s2612_s0 + $0x8] sm:$0xff]  ;;  %v1226_v38 = vld [vmem:[%s2612_s0] sm:$0xff]  ;;  %s1578_s19 = sshll.u32 (%p2722_p12), %s2048_s28, 3  ;;  %s2723_s18 = sld [smem:[#allocation14_spill]] (%p2722_p12) }
 0x42e   : > { %1751 = vmatmul.mubr.msk.f32.vlgmr.msra.gmra.mrb[6].mxu0 %vm719_vm4, %v1231_v2  ;;  %v1229_v40 = vld [vmem:[%s2612_s0 + $0x18] sm:$0xff]  ;;  %v1228_v43 = vld [vmem:[%s2612_s0 + $0x10] sm:$0xff]  ;;  %s1347_s11 = sadd.s32 (%p2722_p12), %s2044_s27, %s1578_s19 }
 0x42f   : > { %1753 = vmatprep.mubr.msk.f32.mxu0 %vm719_vm4, %v1232_v24  ;;  %s1579_s6 = sshll.u32 (%p2722_p12), %s1347_s11, 3 }
 0x432   : > { %1754 = vmatmul.mubr.msk.f32.gmra.mrb[12].mxu0 %vm719_vm4, %v1233_v48 }
 0x433   : > { %s1349_s2 = scalar_lea.vmem (%p2722_p12), %s2723_s18, %s1579_s6 }
 0x501   : > { %v1752_v13 = vpop.f32.mrb[6].mxu0 }
 0x502   : > { %v1332_v39 = vadd.f32 %v1752_v13, %v1227_v4  ;;  %v1312_v31 = vpop.f32.mrb[7].mxu0 }
 0x503   : > { %v1331_v41 = vadd.f32 %v1312_v31, %v1226_v38  ;;  %1345 = sbr.rel (!%p2722_p12) target bundleno = 1298 (0x512), region = 56 }
 0x504   : > { %1336 = vst [vmem:[%s2612_s0 + $0x8] sm:$0xff] %v1332_v39 }
 0x505   : > { %1335 = vst [vmem:[%s2612_s0] sm:$0xff] %v1331_v41  ;;  %v1755_v28 = vpop.f32.mrb[12].mxu0 }
 0x506   : > { %v1334_v45 = vadd.f32 %v1755_v28, %v1229_v40  ;;  %v1322_v36 = vpop.f32.mrb[13].mxu0 }
 0x507   : > { %v1333_v46 = vadd.f32 %v1322_v36, %v1228_v43 }
 0x508   : > { %1338 = vst [vmem:[%s2612_s0 + $0x18] sm:$0xff] %v1334_v45 }
 0x509   : > { %1337 = vst [vmem:[%s2612_s0 + $0x10] sm:$0xff] %v1333_v46 }
 0x50b   : > { %v1385_v18 = vld [vmem:[%s2612_s0 + $0x8] sm:$0xff] }
 0x50c   : > { %v1383_v34 = vld [vmem:[%s2612_s0] sm:$0xff]  ;;  %1386 = vst [vmem:[%s1349_s2 + $0x10] sm:$0xff] %v1385_v18 }
 0x50d   : > { %1384 = vst [vmem:[%s1349_s2] sm:$0xff] %v1383_v34 }
 0x50f   : > { %v1389_v21 = vld [vmem:[%s2612_s0 + $0x18] sm:$0xff] }
 0x510   : > { %v1387_v19 = vld [vmem:[%s2612_s0 + $0x10] sm:$0xff]  ;;  %1390 = vst [vmem:[%s1349_s2 + $0x30] sm:$0xff] %v1389_v21 }
 0x511   : > { %1388 = vst [vmem:[%s1349_s2 + $0x20] sm:$0xff] %v1387_v19 }
 0x512 PF: > { %s19_s8 = sadd.s32 1, %s2064_s8   ;;  %s2724_s27 = sld [smem:[#allocation9_spill]] }
 0x513   : > { %p16_p13 = scmp.ge.s32.totalorder %s19_s8, 18   ;;  %s2725_s17 = sld [smem:[#allocation6_spill]] }
 0x514   : > { %s2726_s12 = sld [smem:[#allocation7_spill]]  ;;  %s2727_s0 = sld [smem:[#allocation8_spill]] }
 0x515   : > { %s2728_s21 = smov %s2024_s22  ;;  %s2729_s22 = smov %s2208_s14 }
 0x516   : > { %s2730_s23 = smov %s2032_s24  ;;  %s2731_s24 = smov %s2036_s25 }
 0x517   : > { %s2733_s26 = smov %s2052_s29  ;;  %s2735_s28 = smov %s2060_s7 }
 0x518   : > { %s2732_s25 = smov %s2724_s27  ;;  %s2734_s27 = smov %s2056_s30 }
 0x519   : > { %s2736_s29 = smov %s2725_s17  ;;  %18 = sbr.rel (!%p16_p13) target bundleno = 13 (0xd), region = 138 }
 0x51a   : > { %s2737_s30 = smov %s2726_s12  ;;  %s2738_s7 = smov %s2727_s0 }
 0x520   :  { %1406 = vsyncpa [#allocation3], 1 }
 0x521   :  { %1408 = vsyncpa [#allocation3 + $0x1], 1 }

</bundles_post_ra>
